<compile_context>
chip_gen: v7x
topology: tpu7x:2x2x1
jax: 0.10.0
libtpu: 0.0.40
codegen_flags: <defaults>
</compile_context>

<pallas_src>
import functools

import jax
import jax.numpy as jnp
from jax.experimental import pallas as pl
from jax.experimental.pallas import tpu as pltpu


def _round_up(x, m):
    return (x + m - 1) // m * m


# ------------------------------ Pallas kernel --------------------------------
def _mhea_kernel(dims, q_ref, e_ref, v_ref, w_ref, c_ref, x_ref, ef_ref, p_ref):
    dn, de, da, H, ne1, BW = dims
    f32, bf16 = jnp.float32, jnp.bfloat16

    # ---- stage 1: fused [nn_edge-L1 | proj_query | proj_edge | proj_value] ---
    # three small dots against row-bands of the slab (no activation concat)
    s1 = jnp.dot(q_ref[...], w_ref[0:dn, 0:BW], preferred_element_type=f32)
    s1 = s1 + jnp.dot(e_ref[...], w_ref[dn:dn + de, 0:BW],
                      preferred_element_type=f32)
    s1 = s1 + jnp.dot(v_ref[...], w_ref[dn + de:2 * dn + de, 0:BW],
                      preferred_element_type=f32)
    s1 = s1 + c_ref[0:1, 0:BW]                                # fused bias row
    # selective ReLU via baked keep row (0 on nn_edge-hidden lanes, 1 elsewhere)
    #   keep=0 -> max(s1, 0) = relu ; keep=1 -> max(s1, s1) = s1
    s1m = jnp.maximum(s1, s1 * c_ref[1:2, 0:BW])

    # ---- stage 2 (full 128-lane band): [a1 pre-act | edge_feature | 0...] ----
    s2 = jnp.dot(s1m.astype(bf16), w_ref[:, BW:2 * BW],
                 preferred_element_type=f32) + c_ref[0:1, BW:2 * BW]

    # ---- stage 3 (full band): head-interleaved attention logits --------------
    # relu over the whole band is safe: non-a1 rows of the stage-3 weights are 0
    a1 = jnp.maximum(s2, 0.0)
    s3 = jnp.dot(a1.astype(bf16), w_ref[:, 2 * BW:3 * BW],
                 preferred_element_type=f32) + c_ref[0:1, 2 * BW:3 * BW]

    # ---- segmented (per-head) softmax, exact per-head max --------------------
    # baked (-1e30 / one-hot) rows; H is a tiny static constant -> unrolled.
    stab = jnp.zeros_like(s3)
    for h in range(H):
        m_h = jnp.max(s3 + c_ref[2 + h:3 + h, 2 * BW:3 * BW],
                      axis=1, keepdims=True)                  # (TB, 1)
        stab = stab + m_h * c_ref[2 + H + h:3 + H + h, 2 * BW:3 * BW]
    ex = jnp.exp(s3 - stab)                                   # <= 1, no overflow
    # per-head denominators: one bf16 dot against the baked same-head band;
    # rows/cols >= da of that band are zero, so pad lanes contribute nothing.
    denom = jnp.dot(ex.astype(bf16), w_ref[:, 3 * BW:4 * BW],
                    preferred_element_type=f32)               # >= ~1 per head
    prob = ex[:, 0:da] * pl.reciprocal(denom[:, 0:da], approx=True)   # EUP vrcp

    # ---- outputs --------------------------------------------------------------
    v_p = s1m[:, ne1 + dn + de:ne1 + dn + de + da]            # proj_value lanes
    x_ref[...] = prob * v_p
    ef_ref[...] = s2[:, ne1:ne1 + de]                         # pre-relu lanes
    p_ref[...] = prob


# ------------------- one-time weight packing (host side) ---------------------
def pack_params(params, *, num_heads, dim_node, dim_edge, dim_atten):
    """Fold all module weights into one bf16 slab + one small f32 constants block."""
    H = num_heads
    dn, de, da = dim_node, dim_edge, dim_atten
    d_n, d_e, d_o = dn // H, de // H, da // H
    Cin = d_n + d_e
    ne1 = dn + de                        # nn_edge hidden width == H * Cin
    K1 = 2 * dn + de
    N1 = ne1 + dn + de + da
    N2 = ne1 + de
    N3 = da
    f32 = jnp.float32
    eyeH = jnp.eye(H, dtype=f32)

    BW = _round_up(max(N1, N2, N3), 128)
    Kp = BW        # stages 2/3 + denominator consume the full-band LHS

    # band 0: rows = [q | e | v] (raw), cols = [nn_edge-L1 | q_p | e_p | v_p]
    W1 = jnp.zeros((Kp, BW), f32)
    W1 = W1.at[0:K1, 0:ne1].set(params['We1'].T)
    W1 = W1.at[0:dn, ne1:ne1 + dn].set(params['Wq'].T)
    W1 = W1.at[dn:dn + de, ne1 + dn:ne1 + dn + de].set(params['Wpe'].T)
    W1 = W1.at[dn + de:K1, ne1 + dn + de:N1].set(params['Wv'].T)
    b1 = jnp.concatenate([params['be1'], params['bq'], params['bpe'], params['bv']])

    # per-head Conv1d(k=1) weights as block-diagonals in the head-interleaved
    # flat layout (channel-major, head fastest) -> no in-kernel reshuffle.
    A1T = params['Wa1'].T                # (Cin_in, Cin_out)
    A2T = params['Wa2'].T                # (Cin, d_o)
    Wa1_il = (A1T[:, None, :, None] * eyeH[None, :, None, :]).reshape(Cin * H, Cin * H)
    Wa2_il = (A2T[:, None, :, None] * eyeH[None, :, None, :]).reshape(Cin * H, d_o * H)
    ba1_il = jnp.repeat(params['ba1'], H)
    ba2_il = jnp.repeat(params['ba2'], H)

    # band 1: rows follow stage-1 output lanes; cols = [a1 pre-act | edge_feat]
    W2 = jnp.zeros((Kp, BW), f32)
    W2 = W2.at[ne1:ne1 + Cin * H, 0:Cin * H].set(Wa1_il)      # Cin*H == ne1
    W2 = W2.at[0:ne1, ne1:ne1 + de].set(params['We2'].T)
    b2 = jnp.zeros((BW,), f32).at[0:Cin * H].set(ba1_il).at[ne1:ne1 + de].set(params['be2'])

    # band 2: rows follow relu(stage-2) lanes; only the a1 rows are nonzero
    W3 = jnp.zeros((Kp, BW), f32)
    W3 = W3.at[0:Cin * H, 0:d_o * H].set(Wa2_il)
    b3 = jnp.zeros((BW,), f32).at[0:d_o * H].set(ba2_il)

    # band 3: same-head indicator (softmax denominators); zero outside [0, N3)
    lane = jnp.arange(BW)
    in_head = lane < N3
    Wseg = ((lane[:, None] % H == lane[None, :] % H)
            & in_head[:, None] & in_head[None, :]).astype(f32)

    wpk = jnp.concatenate([W1, W2, W3, Wseg], axis=1).astype(jnp.bfloat16)

    # constant rows: 0=biases, 1=keep mask, 2..2+H=neg masks, 2+H..2+2H=one-hots
    R = 2 + 2 * H
    cst = jnp.zeros((R, 3 * BW), f32)
    cst = cst.at[0, 0:N1].set(b1)
    cst = cst.at[0, BW:2 * BW].set(b2)
    cst = cst.at[0, 2 * BW:3 * BW].set(b3)
    cst = cst.at[1, 0:BW].set((lane >= ne1).astype(f32))      # 0=relu, 1=pass
    for h in range(H):
        sel = in_head & (lane % H == h)
        cst = cst.at[2 + h, 2 * BW:3 * BW].set(jnp.where(sel, 0.0, -1e30))
        cst = cst.at[2 + H + h, 2 * BW:3 * BW].set(sel.astype(f32))
    return wpk, cst


# --------------------------------- wrapper ------------------------------------
def multi_headed_edge_attention(wpk, cst, query, edge, value, *,
                                num_heads, dim_node, dim_edge, dim_atten,
                                batch_tile=1024):
    B = query.shape[0]
    H, dn, de, da = num_heads, dim_node, dim_edge, dim_atten
    d_o = da // H
    ne1 = dn + de
    BW = wpk.shape[1] // 4
    Kp = wpk.shape[0]
    R = cst.shape[0]

    # activations carried in bf16 (half the input HBM bytes; MXU consumes bf16).
    # In a real model the upstream producer should already emit bf16.
    qb = query.astype(jnp.bfloat16)
    eb = edge.astype(jnp.bfloat16)
    vb = value.astype(jnp.bfloat16)

    # batch tiling: big tiles amortize per-step overhead; once the batch is
    # large, force >=2 grid steps so v7x megacore ("parallel") can split it.
    if B <= batch_tile:
        TB = _round_up((B + 1) // 2, 8) if B >= 512 else B
    else:
        TB = max((batch_tile // 8) * 8, 8)
    Bp = -(-B // TB) * TB
    if Bp != B:
        pad = ((0, Bp - B), (0, 0))
        qb, eb, vb = [jnp.pad(a, pad) for a in (qb, eb, vb)]
    grid = (Bp // TB,)

    # VMEM budget from the actual tile sizes, capped per generation
    # (v7x: 64 MiB physical/TC -> leave headroom; v5e/v6e: 128 MiB).
    try:
        cap = int(pltpu.get_tpu_info().vmem_capacity_bytes) * 3 // 4
    except Exception:
        cap = 48 * 2**20
    tile_bytes = TB * (2 * dn + de) * 2 + TB * (2 * da + de) * 4
    const_bytes = Kp * 4 * BW * 2 + R * 3 * BW * 4
    scratch_bytes = 12 * TB * BW * 4
    vmem_limit = int(min(cap, max(16 * 2**20,
                                  2 * tile_bytes + const_bytes + scratch_bytes)))

    dims = (dn, de, da, H, ne1, BW)
    kernel = functools.partial(_mhea_kernel, dims)

    x, ef, prob = pl.pallas_call(
        kernel,
        out_shape=(jax.ShapeDtypeStruct((Bp, da), jnp.float32),
                   jax.ShapeDtypeStruct((Bp, de), jnp.float32),
                   jax.ShapeDtypeStruct((Bp, da), jnp.float32)),
        grid=grid,
        in_specs=[
            pl.BlockSpec((TB, dn), lambda i: (i, 0)),     # query tile (bf16)
            pl.BlockSpec((TB, de), lambda i: (i, 0)),     # edge tile  (bf16)
            pl.BlockSpec((TB, dn), lambda i: (i, 0)),     # value tile (bf16)
            # pinned constants (constant index_map -> fetched once).
            # pipeline_mode=pl.Buffered(1) would shave their second buffer
            # (~140 KB) if the slab ever grows; not worth the risk here.
            pl.BlockSpec((Kp, 4 * BW), lambda i: (0, 0)),  # bf16 weight slab
            pl.BlockSpec((R, 3 * BW), lambda i: (0, 0)),   # f32 bias/mask rows
        ],
        out_specs=[pl.BlockSpec((TB, da), lambda i: (i, 0)),   # x
                   pl.BlockSpec((TB, de), lambda i: (i, 0)),   # edge_feature
                   pl.BlockSpec((TB, da), lambda i: (i, 0))],  # prob (flat)
        compiler_params=pltpu.CompilerParams(
            dimension_semantics=("parallel",),
            vmem_limit_bytes=vmem_limit),
    )(qb, eb, vb, wpk, cst)

    if Bp != B:
        x, ef, prob = x[:B], ef[:B], prob[:B]
    return x, ef, prob.reshape(B, d_o, H)          # pure row-major reshape


# ------------------------- deterministic parameters ---------------------------
def init_params(key, num_heads, dim_node, dim_edge, dim_atten):
    d_n, d_e, d_o = dim_node // num_heads, dim_edge // num_heads, dim_atten // num_heads
    ks = jax.random.split(key, 7)

    def lin(k, fan_in, fan_out):
        bound = 1.0 / jnp.sqrt(jnp.float32(fan_in))
        kw, kb = jax.random.split(k)
        W = jax.random.uniform(kw, (fan_out, fan_in), jnp.float32, -bound, bound)
        b = jax.random.uniform(kb, (fan_out,), jnp.float32, -bound, bound)
        return W, b

    p = {}
    p['We1'], p['be1'] = lin(ks[0], 2 * dim_node + dim_edge, dim_node + dim_edge)  # nn_edge L1
    p['We2'], p['be2'] = lin(ks[1], dim_node + dim_edge, dim_edge)                  # nn_edge L2
    p['Wq'], p['bq'] = lin(ks[2], dim_node, dim_node)                               # proj_query
    p['Wpe'], p['bpe'] = lin(ks[3], dim_edge, dim_edge)                             # proj_edge
    p['Wv'], p['bv'] = lin(ks[4], dim_node, dim_atten)                              # proj_value
    p['Wa1'], p['ba1'] = lin(ks[5], d_n + d_e, d_n + d_e)                           # attn Conv1d k=1
    p['Wa2'], p['ba2'] = lin(ks[6], d_n + d_e, d_o)                                 # attn Conv1d k=1
    return p


# --------------------------- pure-JAX reference -------------------------------
def reference_forward(p, query, edge, value, *, num_heads, dim_node, dim_edge, dim_atten):
    B = query.shape[0]
    H = num_heads
    d_n, d_e, d_o = dim_node // H, dim_edge // H, dim_atten // H
    t = jnp.concatenate([query, edge, value], axis=1)
    h1 = jax.nn.relu(t @ p['We1'].T + p['be1'])
    edge_feature = h1 @ p['We2'].T + p['be2']
    v_p = value @ p['Wv'].T + p['bv']
    q_p = (query @ p['Wq'].T + p['bq']).reshape(B, d_n, H)
    e_p = (edge @ p['Wpe'].T + p['bpe']).reshape(B, d_e, H)
    qe = jnp.concatenate([q_p, e_p], axis=1)                       # (B, d_n+d_e, H)
    a1 = jax.nn.relu(jnp.einsum('oc,bch->boh', p['Wa1'], qe) + p['ba1'][None, :, None])
    logits = jnp.einsum('oc,bch->boh', p['Wa2'], a1) + p['ba2'][None, :, None]
    prob = jax.nn.softmax(logits, axis=1)
    x = prob.reshape(B, dim_atten) * v_p
    return x, edge_feature, prob


if __name__ == "__main__":
    num_heads, dim_node, dim_edge, dim_atten = 2, 32, 16, 32
    B = 8

    key = jax.random.PRNGKey(0)
    kq, ke, kv, kp = jax.random.split(key, 4)
    query = jax.random.normal(kq, (B, dim_node), jnp.float32)
    edge = jax.random.normal(ke, (B, dim_edge), jnp.float32)
    value = jax.random.normal(kv, (B, dim_node), jnp.float32)
    params = init_params(kp, num_heads, dim_node, dim_edge, dim_atten)

    # one-time weight packing, hoisted out of the per-call path
    wpk, cst = pack_params(params, num_heads=num_heads, dim_node=dim_node,
                           dim_edge=dim_edge, dim_atten=dim_atten)

    fwd = jax.jit(functools.partial(
        multi_headed_edge_attention,
        num_heads=num_heads, dim_node=dim_node,
        dim_edge=dim_edge, dim_atten=dim_atten))

    x, edge_feature, prob = fwd(wpk, cst, query, edge, value)
    jax.block_until_ready((x, edge_feature, prob))

    # sanity check against a pure-JAX f32 reference
    # (tolerance accommodates bf16 activations/MXU operands + approx reciprocal)
    xr, efr, pr = reference_forward(
        params, query, edge, value,
        num_heads=num_heads, dim_node=dim_node, dim_edge=dim_edge, dim_atten=dim_atten)
    assert x.shape == (B, dim_atten) and edge_feature.shape == (B, dim_edge)
    assert prob.shape == (B, dim_atten // num_heads, num_heads)
    assert jnp.allclose(x, xr, atol=2e-2, rtol=2e-2)
    assert jnp.allclose(edge_feature, efr, atol=2e-2, rtol=2e-2)
    assert jnp.allclose(prob, pr, atol=2e-2, rtol=2e-2)

    print("KERNEL_OK")
</pallas_src>

<mosaic_0001>
module attributes {stable_mosaic.version = 11 : i64} {
  func.func @_mhea_kernel(%arg0: i32, %arg1: memref<8x32xbf16, #tpu.memory_space<vmem>>, %arg2: memref<8x16xbf16, #tpu.memory_space<vmem>>, %arg3: memref<8x32xbf16, #tpu.memory_space<vmem>>, %arg4: memref<128x512xbf16, #tpu.memory_space<vmem>>, %arg5: memref<6x384xf32, #tpu.memory_space<vmem>>, %arg6: memref<8x32xf32, #tpu.memory_space<vmem>>, %arg7: memref<8x16xf32, #tpu.memory_space<vmem>>, %arg8: memref<8x32xf32, #tpu.memory_space<vmem>>) attributes {dimension_semantics = [#tpu.dimension_semantics<parallel>], iteration_bounds = array<i64: 1>, scalar_prefetch = 0 : i64, scratch_operands = 0 : i64, tpu.core_type = #tpu.core_type<tc>, window_params = [{transform_indices = @transform_0, window_bounds = array<i64: 8, 32>}, {transform_indices = @transform_1, window_bounds = array<i64: 8, 16>}, {transform_indices = @transform_2, window_bounds = array<i64: 8, 32>}, {pipeline_mode = #tpu.pipeline_mode<synchronous>, transform_indices = @transform_3, window_bounds = array<i64: 128, 512>}, {pipeline_mode = #tpu.pipeline_mode<synchronous>, transform_indices = @transform_4, window_bounds = array<i64: 6, 384>}, {transform_indices = @transform_5, window_bounds = array<i64: 8, 32>}, {transform_indices = @transform_6, window_bounds = array<i64: 8, 16>}, {transform_indices = @transform_7, window_bounds = array<i64: 8, 32>}]} {
    %c0 = arith.constant 0 : index
    %c0_0 = arith.constant 0 : index
    %0 = vector.load %arg1[%c0, %c0_0] : memref<8x32xbf16, #tpu.memory_space<vmem>>, vector<8x32xbf16>
    %c0_1 = arith.constant 0 : index
    %c0_2 = arith.constant 0 : index
    %1 = vector.load %arg4[%c0_1, %c0_2] : memref<128x512xbf16, #tpu.memory_space<vmem>>, vector<32x128xbf16>
    %cst = arith.constant dense<0.000000e+00> : vector<8x128xf32>
    %2 = tpu.matmul %0, %1, %cst {dimension_numbers = #tpu.dot_dimension_numbers<[1], [0], [0], [1], [0, 0, 1, 1], [], []>} : vector<8x32xbf16>, vector<32x128xbf16>, vector<8x128xf32> -> vector<8x128xf32>
    %c0_3 = arith.constant 0 : index
    %c0_4 = arith.constant 0 : index
    %3 = vector.load %arg2[%c0_3, %c0_4] : memref<8x16xbf16, #tpu.memory_space<vmem>>, vector<8x16xbf16>
    %c32 = arith.constant 32 : index
    %c0_5 = arith.constant 0 : index
    %4 = vector.load %arg4[%c32, %c0_5] : memref<128x512xbf16, #tpu.memory_space<vmem>>, vector<16x128xbf16>
    %cst_6 = arith.constant dense<0.000000e+00> : vector<8x128xf32>
    %5 = tpu.matmul %3, %4, %cst_6 {dimension_numbers = #tpu.dot_dimension_numbers<[1], [0], [0], [1], [0, 0, 1, 1], [], []>} : vector<8x16xbf16>, vector<16x128xbf16>, vector<8x128xf32> -> vector<8x128xf32>
    %6 = arith.addf %2, %5 : vector<8x128xf32>
    %c0_7 = arith.constant 0 : index
    %c0_8 = arith.constant 0 : index
    %7 = vector.load %arg3[%c0_7, %c0_8] : memref<8x32xbf16, #tpu.memory_space<vmem>>, vector<8x32xbf16>
    %c48 = arith.constant 48 : index
    %c0_9 = arith.constant 0 : index
    %8 = vector.load %arg4[%c48, %c0_9] : memref<128x512xbf16, #tpu.memory_space<vmem>>, vector<32x128xbf16>
    %cst_10 = arith.constant dense<0.000000e+00> : vector<8x128xf32>
    %9 = tpu.matmul %7, %8, %cst_10 {dimension_numbers = #tpu.dot_dimension_numbers<[1], [0], [0], [1], [0, 0, 1, 1], [], []>} : vector<8x32xbf16>, vector<32x128xbf16>, vector<8x128xf32> -> vector<8x128xf32>
    %10 = arith.addf %6, %9 : vector<8x128xf32>
    %c0_11 = arith.constant 0 : index
    %c0_12 = arith.constant 0 : index
    %11 = vector.load %arg5[%c0_11, %c0_12] : memref<6x384xf32, #tpu.memory_space<vmem>>, vector<1x128xf32>
    %12 = vector.broadcast %11 : vector<1x128xf32> to vector<8x128xf32>
    %13 = arith.addf %10, %12 : vector<8x128xf32>
    %c1 = arith.constant 1 : index
    %c0_13 = arith.constant 0 : index
    %14 = vector.load %arg5[%c1, %c0_13] : memref<6x384xf32, #tpu.memory_space<vmem>>, vector<1x128xf32>
    %15 = vector.broadcast %14 : vector<1x128xf32> to vector<8x128xf32>
    %16 = arith.mulf %13, %15 : vector<8x128xf32>
    %17 = arith.maximumf %13, %16 : vector<8x128xf32>
    %18 = arith.truncf %17 : vector<8x128xf32> to vector<8x128xbf16>
    %c0_14 = arith.constant 0 : index
    %c128 = arith.constant 128 : index
    %19 = vector.load %arg4[%c0_14, %c128] : memref<128x512xbf16, #tpu.memory_space<vmem>>, vector<128x128xbf16>
    %cst_15 = arith.constant dense<0.000000e+00> : vector<8x128xf32>
    %20 = tpu.matmul %18, %19, %cst_15 {dimension_numbers = #tpu.dot_dimension_numbers<[1], [0], [0], [1], [0, 0, 1, 1], [], []>} : vector<8x128xbf16>, vector<128x128xbf16>, vector<8x128xf32> -> vector<8x128xf32>
    %c0_16 = arith.constant 0 : index
    %c128_17 = arith.constant 128 : index
    %21 = vector.load %arg5[%c0_16, %c128_17] : memref<6x384xf32, #tpu.memory_space<vmem>>, vector<1x128xf32>
    %22 = vector.broadcast %21 : vector<1x128xf32> to vector<8x128xf32>
    %23 = arith.addf %20, %22 : vector<8x128xf32>
    %cst_18 = arith.constant 0.000000e+00 : f32
    %24 = vector.broadcast %cst_18 : f32 to vector<8x128xf32>
    %25 = arith.maximumf %23, %24 : vector<8x128xf32>
    %26 = arith.truncf %25 : vector<8x128xf32> to vector<8x128xbf16>
    %c0_19 = arith.constant 0 : index
    %c256 = arith.constant 256 : index
    %27 = vector.load %arg4[%c0_19, %c256] : memref<128x512xbf16, #tpu.memory_space<vmem>>, vector<128x128xbf16>
    %cst_20 = arith.constant dense<0.000000e+00> : vector<8x128xf32>
    %28 = tpu.matmul %26, %27, %cst_20 {dimension_numbers = #tpu.dot_dimension_numbers<[1], [0], [0], [1], [0, 0, 1, 1], [], []>} : vector<8x128xbf16>, vector<128x128xbf16>, vector<8x128xf32> -> vector<8x128xf32>
    %c0_21 = arith.constant 0 : index
    %c256_22 = arith.constant 256 : index
    %29 = vector.load %arg5[%c0_21, %c256_22] : memref<6x384xf32, #tpu.memory_space<vmem>>, vector<1x128xf32>
    %30 = vector.broadcast %29 : vector<1x128xf32> to vector<8x128xf32>
    %31 = arith.addf %28, %30 : vector<8x128xf32>
    %cst_23 = arith.constant 0.000000e+00 : f32
    %32 = vector.broadcast %cst_23 : f32 to vector<8x128xf32>
    %c2 = arith.constant 2 : index
    %c256_24 = arith.constant 256 : index
    %33 = vector.load %arg5[%c2, %c256_24] : memref<6x384xf32, #tpu.memory_space<vmem>>, vector<1x128xf32>
    %34 = vector.broadcast %33 : vector<1x128xf32> to vector<8x128xf32>
    %35 = arith.addf %31, %34 : vector<8x128xf32>
    %cst_25 = arith.constant dense<0xFF800000> : vector<8xf32>
    %36 = vector.multi_reduction <maximumf>, %35, %cst_25 [1] : vector<8x128xf32> to vector<8xf32>
    %37 = vector.shape_cast %36 : vector<8xf32> to vector<8x1xf32>
    %c4 = arith.constant 4 : index
    %c256_26 = arith.constant 256 : index
    %38 = vector.load %arg5[%c4, %c256_26] : memref<6x384xf32, #tpu.memory_space<vmem>>, vector<1x128xf32>
    %39 = vector.broadcast %37 : vector<8x1xf32> to vector<8x128xf32>
    %40 = vector.broadcast %38 : vector<1x128xf32> to vector<8x128xf32>
    %41 = arith.mulf %39, %40 : vector<8x128xf32>
    %42 = arith.addf %32, %41 : vector<8x128xf32>
    %c3 = arith.constant 3 : index
    %c256_27 = arith.constant 256 : index
    %43 = vector.load %arg5[%c3, %c256_27] : memref<6x384xf32, #tpu.memory_space<vmem>>, vector<1x128xf32>
    %44 = vector.broadcast %43 : vector<1x128xf32> to vector<8x128xf32>
    %45 = arith.addf %31, %44 : vector<8x128xf32>
    %cst_28 = arith.constant dense<0xFF800000> : vector<8xf32>
    %46 = vector.multi_reduction <maximumf>, %45, %cst_28 [1] : vector<8x128xf32> to vector<8xf32>
    %47 = vector.shape_cast %46 : vector<8xf32> to vector<8x1xf32>
    %c5 = arith.constant 5 : index
    %c256_29 = arith.constant 256 : index
    %48 = vector.load %arg5[%c5, %c256_29] : memref<6x384xf32, #tpu.memory_space<vmem>>, vector<1x128xf32>
    %49 = vector.broadcast %47 : vector<8x1xf32> to vector<8x128xf32>
    %50 = vector.broadcast %48 : vector<1x128xf32> to vector<8x128xf32>
    %51 = arith.mulf %49, %50 : vector<8x128xf32>
    %52 = arith.addf %42, %51 : vector<8x128xf32>
    %53 = arith.subf %31, %52 : vector<8x128xf32>
    %54 = math.exp %53 : vector<8x128xf32>
    %55 = arith.truncf %54 : vector<8x128xf32> to vector<8x128xbf16>
    %c0_30 = arith.constant 0 : index
    %c384 = arith.constant 384 : index
    %56 = vector.load %arg4[%c0_30, %c384] : memref<128x512xbf16, #tpu.memory_space<vmem>>, vector<128x128xbf16>
    %cst_31 = arith.constant dense<0.000000e+00> : vector<8x128xf32>
    %57 = tpu.matmul %55, %56, %cst_31 {dimension_numbers = #tpu.dot_dimension_numbers<[1], [0], [0], [1], [0, 0, 1, 1], [], []>} : vector<8x128xbf16>, vector<128x128xbf16>, vector<8x128xf32> -> vector<8x128xf32>
    %58 = vector.extract_strided_slice %54 {offsets = [0, 0], sizes = [8, 32], strides = [1, 1]} : vector<8x128xf32> to vector<8x32xf32>
    %59 = vector.extract_strided_slice %57 {offsets = [0, 0], sizes = [8, 32], strides = [1, 1]} : vector<8x128xf32> to vector<8x32xf32>
    %60 = tpu.reciprocal %59 {approx = true} : vector<8x32xf32> -> vector<8x32xf32>
    %61 = arith.mulf %58, %60 : vector<8x32xf32>
    %62 = vector.extract_strided_slice %17 {offsets = [0, 96], sizes = [8, 32], strides = [1, 1]} : vector<8x128xf32> to vector<8x32xf32>
    %63 = arith.mulf %61, %62 : vector<8x32xf32>
    %c0_32 = arith.constant 0 : index
    %c0_33 = arith.constant 0 : index
    %64 = vector.load %arg6[%c0_32, %c0_33] : memref<8x32xf32, #tpu.memory_space<vmem>>, vector<8x32xf32>
    tpu.vector_store %arg6[%c0_32, %c0_33], %63 {strides = array<i32>} : memref<8x32xf32, #tpu.memory_space<vmem>>, vector<8x32xf32>,
    %65 = vector.extract_strided_slice %23 {offsets = [0, 48], sizes = [8, 16], strides = [1, 1]} : vector<8x128xf32> to vector<8x16xf32>
    %c0_34 = arith.constant 0 : index
    %c0_35 = arith.constant 0 : index
    %66 = vector.load %arg7[%c0_34, %c0_35] : memref<8x16xf32, #tpu.memory_space<vmem>>, vector<8x16xf32>
    tpu.vector_store %arg7[%c0_34, %c0_35], %65 {strides = array<i32>} : memref<8x16xf32, #tpu.memory_space<vmem>>, vector<8x16xf32>,
    %c0_36 = arith.constant 0 : index
    %c0_37 = arith.constant 0 : index
    %67 = vector.load %arg8[%c0_36, %c0_37] : memref<8x32xf32, #tpu.memory_space<vmem>>, vector<8x32xf32>
    tpu.vector_store %arg8[%c0_36, %c0_37], %61 {strides = array<i32>} : memref<8x32xf32, #tpu.memory_space<vmem>>, vector<8x32xf32>,
    return
  }
  func.func @transform_0(%arg0: i32) -> (i32, i32) {
    %c0_i32 = arith.constant 0 : i32
    %c0_i32_0 = arith.constant 0 : i32
    return %arg0, %c0_i32 : i32, i32
  }
  func.func @transform_1(%arg0: i32) -> (i32, i32) {
    %c0_i32 = arith.constant 0 : i32
    %c0_i32_0 = arith.constant 0 : i32
    return %arg0, %c0_i32 : i32, i32
  }
  func.func @transform_2(%arg0: i32) -> (i32, i32) {
    %c0_i32 = arith.constant 0 : i32
    %c0_i32_0 = arith.constant 0 : i32
    return %arg0, %c0_i32 : i32, i32
  }
  func.func @transform_3(%arg0: i32) -> (i32, i32) {
    %c0_i32 = arith.constant 0 : i32
    %c0_i32_0 = arith.constant 0 : i32
    %c0_i32_1 = arith.constant 0 : i32
    return %c0_i32, %c0_i32_0 : i32, i32
  }
  func.func @transform_4(%arg0: i32) -> (i32, i32) {
    %c0_i32 = arith.constant 0 : i32
    %c0_i32_0 = arith.constant 0 : i32
    %c0_i32_1 = arith.constant 0 : i32
    return %c0_i32, %c0_i32_0 : i32, i32
  }
  func.func @transform_5(%arg0: i32) -> (i32, i32) {
    %c0_i32 = arith.constant 0 : i32
    %c0_i32_0 = arith.constant 0 : i32
    return %arg0, %c0_i32 : i32, i32
  }
  func.func @transform_6(%arg0: i32) -> (i32, i32) {
    %c0_i32 = arith.constant 0 : i32
    %c0_i32_0 = arith.constant 0 : i32
    return %arg0, %c0_i32 : i32, i32
  }
  func.func @transform_7(%arg0: i32) -> (i32, i32) {
    %c0_i32 = arith.constant 0 : i32
    %c0_i32_0 = arith.constant 0 : i32
    return %arg0, %c0_i32 : i32, i32
  }
}

</mosaic_0001>

<bundles_post_ra>
// kernel: multi_headed_edge_attention.1
= control target key start
LH: loop header
LB: loop body
LE: loop exit
PB: predicated region body
PF: predicated region fallthrough
CT: control target
= control target key end

     0   :  { %13 = vsyncpa [#allocation3], 0  ;;  %s1036_s0 = inlined_call_operand.vmem [shape: bf16[8,32], index: 0, kind: input, shape index: {}]   ;;  %s1037_s1 = inlined_call_operand.vmem [shape: bf16[8,16], index: 1, kind: input, shape index: {}]   ;;  %s1038_s2 = inlined_call_operand.vmem [shape: bf16[8,32], index: 2, kind: input, shape index: {}]   ;;  %s1039_s3 = inlined_call_operand.hbm [shape: bf16[128,512], index: 3, kind: input, shape index: {}]   ;;  %s1040_s4 = inlined_call_operand.vmem [shape: f32[6,384], index: 4, kind: input, shape index: {}]   ;;  %s1041_s5 = inlined_call_operand.hbm [shape: f32[8,32], index: 5, kind: output, shape index: {0}]   ;;  %s1042_s6 = inlined_call_operand.hbm [shape: f32[8,16], index: 6, kind: output, shape index: {1}]   ;;  %s1043_s7 = inlined_call_operand.vmem [shape: f32[8,32], index: 7, kind: output, shape index: {2}]  }
   0x1   :  { %14 = vsyncpa [#allocation4], 0 }
   0x2   :  { %15 = vsyncpa [#allocation7], 0  ;;  %s865_s24 = smov [#allocation2]   ;;  %s793_s28 = scalar_lea.hbm %s1039_s3, 4096 }
   0x3   :  { %s27_s25 = sshll.u32 %s865_s24, 4  ;;  %p794_p0 = scmp.ne.s32.totalorder %s1039_s3, %s793_s28  ;;  %s28_s25 = int_to_ptr.vmem [resolvable:$true] %s27_s25 }
   0x4   :  { %p797_p1 = scmp.lt.u32.totalorder %s793_s28, %s1039_s3 }
   0x6   :  { %p799_p2 = pnand %p797_p1, %p794_p0 }
   0x8   :  { %802 = shalt.err (!%p799_p2)
}
   0x9   :  { %s803_s10 = scalar_lea.vmem %s28_s25, 4096  ;;  %p808_p4 = scmp.lt.s32.totalorder %s28_s25, %s28_s25 }
   0xa   :  { %p804_p3 = scmp.ne.s32.totalorder %s28_s25, %s803_s10  ;;  %p809_p5 = scmp.lt.s32.totalorder %s803_s10, %s803_s10 }
   0xc   :  { %p810_p6 = por %p809_p5, %p808_p4 }
   0xe   :  { %p811_p7 = pnand %p810_p6, %p804_p3 }
  0x10   :  { %814 = shalt.err (!%p811_p7)
}
  0x11   :  { %s866_s11 = smov 256   ;;  %s867_s12 = smov 16  }
  0x12   :  { %33 = dma.hbm_to_vmem [thread:$0]  %s1039_s3, 4096, %s28_s25, [#allocation3], %s866_s11, %s866_s11, %s867_s12  }
  0x13   :  { %859 = dma.done.wait [#allocation3], 4096  }
  0x14   :  { %860 = vsyncadd [#allocation3], 4294963200  ;;  %v868_v0 = vmov 0.0   ;;  %vm869_vm0 = vmmov 0   ;;  %vm54_vm1 = vcmask 130048   ;;  %vm110_vm2 = vcmask 261120  }
  0x15   :  { %669 = vmatprep.subr.bf16.mxu0 %v868_v0  ;;  %671 = vmatprep.mubr.msk.bf16.mxu0 %vm869_vm0, %v868_v0  ;;  %v760_v1 = vld [vmem:[#allocation2 + $0x40] ss:$16 sps:$4 sm:$0xff]   ;;  %v765_v5 = vld [vmem:[#allocation2 + $0x4] ss:$16 sps:$4 sm:$0xff]   ;;  %v773_v26 = vld [vmem:[#allocation2 + $0x8] ss:$16 sps:$4 sm:$0xff]  }
  0x16   :  { %691 = vmatprep.subr.bf16.mxu1 %v868_v0  ;;  %707 = vmatprep.mubr.msk.bf16.mxu1 %vm869_vm0, %v868_v0  ;;  %v45_v2 = vld [vmem:[%s1037_s1] sm:$0xf]  ;;  %v766_v10 = vld [vmem:[#allocation2 + $0x24] ss:$16 sps:$4 sm:$0xff]   ;;  %v774_v27 = vld [vmem:[#allocation2 + $0x28] ss:$16 sps:$4 sm:$0xff]  }
  0x17   :  { %670 = vmatpush3.bf16.msra.mxu0 %v760_v1  ;;  %v761_v3 = vld [vmem:[#allocation2] ss:$16 sps:$4 sm:$0xff]   ;;  %692 = vmatpush3.bf16.msra.mxu1 %v765_v5  ;;  %v767_v11 = vld [vmem:[#allocation2 + $0x44] ss:$16 sps:$4 sm:$0xff]   ;;  %v775_v32 = vld [vmem:[#allocation2 + $0x48] ss:$16 sps:$4 sm:$0xff]  }
  0x18   :  { %675 = vmatprep.subr.bf16.mxu0 %v868_v0  ;;  %v762_v4 = vld [vmem:[#allocation2 + $0x20] ss:$16 sps:$4 sm:$0xff]   ;;  %693 = vmatprep.subr.bf16.mxu1 %v868_v0  ;;  %v768_v12 = vld [vmem:[#allocation2 + $0x64] ss:$16 sps:$4 sm:$0xff]   ;;  %v776_v38 = vld [vmem:[#allocation2 + $0x68] ss:$16 sps:$4 sm:$0xff]  }
  0x19   :  { %v40_v6 = vld [vmem:[%s1036_s0] sm:$0xf]  ;;  %v769_v13 = vld [vmem:[#allocation2 + $0x84] ss:$16 sps:$4 sm:$0xff]   ;;  %s870_s21 = smov 32   ;;  %s871_s24 = smov 80  }
  0x1a   :  { %672 = vmatmul.mubr.msk.bf16.vlgmr.msra.gmra.mrb[0].mxu0 %vm54_vm1, %v45_v2  ;;  %v763_v7 = vld [vmem:[#allocation2 + $0x60] ss:$16 sps:$4 sm:$0xff]   ;;  %v770_v14 = vld [vmem:[#allocation2 + $0xa4] ss:$16 sps:$4 sm:$0xff]   ;;  %v777_v41 = vld [vmem:[#allocation2 + $0x88] ss:$16 sps:$4 sm:$0xff]  }
  0x1b   :  { %676 = vmatpush3.bf16.msra.mxu0 %v761_v3  ;;  %679 = vmatprep.mubr.msk.bf16.mxu0 %vm869_vm0, %v868_v0  ;;  %v764_v8 = vld [vmem:[#allocation2 + $0x80] ss:$16 sps:$4 sm:$0xff]   ;;  %v771_v15 = vld [vmem:[#allocation2 + $0xc4] ss:$16 sps:$4 sm:$0xff]   ;;  %v778_v42 = vld [vmem:[#allocation2 + $0xa8] ss:$16 sps:$4 sm:$0xff]  }
  0x1c   :  { %677 = vmatprep.subr.bf16.mxu0 %v868_v0  ;;  %v154_v9 = vld [vmem:[%s1038_s2] sm:$0xf]  ;;  %694 = vmatpush3.bf16.msra.mxu1 %v766_v10  ;;  %v772_v16 = vld [vmem:[#allocation2 + $0xe4] ss:$16 sps:$4 sm:$0xff]   ;;  %v779_v43 = vld [vmem:[#allocation2 + $0xc8] ss:$16 sps:$4 sm:$0xff]  }
  0x1d   :  { %695 = vmatprep.subr.bf16.mxu1 %v868_v0  ;;  %v215_v29 = vld [vmem:[%s1040_s4] ss:$0 sm:$0xff]  ;;  %v217_v34 = vld [vmem:[%s1040_s4 + $0x1] ss:$0 sm:$0xff]  ;;  %v780_v44 = vld [vmem:[#allocation2 + $0xe8] ss:$16 sps:$4 sm:$0xff]  }
  0x1e   :  { %v237_v45 = vld [vmem:[%s1040_s4 + $0x8] ss:$0 sm:$0xff]  ;;  %v781_v53 = vld [vmem:[#allocation2 + $0xc] ss:$16 sps:$4 sm:$0xff]   ;;  %v344_v57 = vld [vmem:[%s1040_s4 + $0x10] ss:$0 sm:$0xff] }
  0x1f   :  { %678 = vmatpush3.bf16.msra.mxu0 %v762_v4  ;;  %v782_v54 = vld [vmem:[#allocation2 + $0x2c] ss:$16 sps:$4 sm:$0xff]   ;;  %v433_v59 = vld [vmem:[%s1040_s4 + $0x12] ss:$0 sm:$0xff]  ;;  %v440_v2 = vld [vmem:[%s1040_s4 + $0x13] ss:$0 sm:$0xff] }
  0x20   :  { %683 = vmatprep.subr.bf16.mxu0 %v868_v0  ;;  %696 = vmatpush3.bf16.msra.mxu1 %v767_v11  ;;  %v783_v4 = vld [vmem:[#allocation2 + $0x4c] ss:$16 sps:$4 sm:$0xff]   ;;  %v437_v11 = vld [vmem:[%s1040_s4 + $0x14] ss:$0 sm:$0xff]  ;;  %s872_s12 = smov [#allocation6]  }
  0x21   :  { %697 = vmatprep.subr.bf16.mxu1 %v868_v0  ;;  %v784_v5 = vld [vmem:[#allocation2 + $0x6c] ss:$16 sps:$4 sm:$0xff]   ;;  %s585_s13 = sshll.u32 %s872_s12, 4  ;;  %s586_s13 = int_to_ptr.vmem [resolvable:$true] %s585_s13 }
  0x22   :  { %680 = vmatmul.mubr.msk.bf16.vlgmr.msra.gmra.mrb[4].mxu0 %vm110_vm2, %v40_v6  ;;  %v785_v6 = vld [vmem:[#allocation2 + $0x8c] ss:$16 sps:$4 sm:$0xff]   ;;  %s815_s14 = scalar_lea.vmem %s586_s13, 128  ;;  %p820_p9 = scmp.lt.s32.totalorder %s586_s13, %s586_s13 }
  0x23   :  { %684 = vmatpush3.bf16.msra.mxu0 %v763_v7  ;;  %687 = vmatprep.mubr.msk.bf16.mxu0 %vm869_vm0, %v868_v0  ;;  %v786_v7 = vld [vmem:[#allocation2 + $0xac] ss:$16 sps:$4 sm:$0xff]   ;;  %p816_p8 = scmp.ne.s32.totalorder %s586_s13, %s815_s14  ;;  %p821_p10 = scmp.lt.s32.totalorder %s815_s14, %s815_s14 }
  0x24   :  { %685 = vmatprep.subr.bf16.mxu0 %v868_v0  ;;  %698 = vmatpush3.bf16.msra.mxu1 %v768_v12  ;;  %v444_v12 = vld [vmem:[%s1040_s4 + $0x15] ss:$0 sm:$0xff] }
  0x25   :  { %699 = vmatprep.subr.bf16.mxu1 %v868_v0  ;;  %p822_p11 = por %p821_p10, %p820_p9 }
  0x27   :  { %686 = vmatpush3.bf16.msra.mxu0 %v764_v8  ;;  %v787_v8 = vld [vmem:[#allocation2 + $0xcc] ss:$16 sps:$4 sm:$0xff]   ;;  %p823_p12 = pnand %p822_p11, %p816_p8 }
  0x28   :  { %711 = vmatprep.subr.bf16.mxu0 %v868_v0  ;;  %700 = vmatpush3.bf16.msra.mxu1 %v769_v13 }
  0x29   :  { %701 = vmatprep.subr.bf16.mxu1 %v868_v0 }
  0x2a   :  { %688 = vmatmul.mubr.msk.bf16.vlgmr.msra.gmra.mrb[8].mxu0 %vm110_vm2, %v154_v9  ;;  %v788_v9 = vld [vmem:[#allocation2 + $0xec] ss:$16 sps:$4 sm:$0xff]  }
  0x2b   :  { %727 = vmatprep.mubr.msk.bf16.mxu0 %vm869_vm0, %v868_v0  ;;  %712 = vmatpush3.bf16.msra.mxu0 %v773_v26 }
  0x2c   :  { %702 = vmatpush3.bf16.msra.mxu1 %v770_v14  ;;  %713 = vmatprep.subr.bf16.mxu0 %v868_v0 }
  0x2d   :  { %703 = vmatprep.subr.bf16.mxu1 %v868_v0 }
  0x2f   :  { %714 = vmatpush3.bf16.msra.mxu0 %v774_v27 }
  0x30   :  { %704 = vmatpush3.bf16.msra.mxu1 %v771_v15  ;;  %715 = vmatprep.subr.bf16.mxu0 %v868_v0 }
  0x31   :  { %705 = vmatprep.subr.bf16.mxu1 %v868_v0 }
  0x33   :  { %716 = vmatpush3.bf16.msra.mxu0 %v775_v32 }
  0x34   :  { %706 = vmatpush3.bf16.msra.mxu1 %v772_v16  ;;  %717 = vmatprep.subr.bf16.mxu0 %v868_v0 }
  0x35   :  { %731 = vmatprep.subr.bf16.mxu1 %v868_v0 }
  0x37   :  { %718 = vmatpush3.bf16.msra.mxu0 %v776_v38 }
  0x38   :  { %719 = vmatprep.subr.bf16.mxu0 %v868_v0 }
  0x3b   :  { %720 = vmatpush3.bf16.msra.mxu0 %v777_v41 }
  0x3c   :  { %721 = vmatprep.subr.bf16.mxu0 %v868_v0 }
  0x3f   :  { %722 = vmatpush3.bf16.msra.mxu0 %v778_v42 }
  0x40   :  { %723 = vmatprep.subr.bf16.mxu0 %v868_v0 }
  0x43   :  { %724 = vmatpush3.bf16.msra.mxu0 %v779_v43 }
  0x44   :  { %725 = vmatprep.subr.bf16.mxu0 %v868_v0 }
  0x47   :  { %726 = vmatpush3.bf16.msra.mxu0 %v780_v44 }
  0xed   :  { %v92_v17 = vpop.f32.mrb[0].mxu0 }
  0xee   :  { %v673_v18 = vpop.f32.mrb[1].mxu0 }
  0xef   :  { %v95_v19 = vpop.f32.mrb[2].mxu0 }
  0xf0   :  { %v674_v20 = vpop.f32.mrb[3].mxu0 }
  0xf5   :  { %v148_v21 = vpop.f32.mrb[4].mxu0 }
  0xf6   :  { %v149_v22 = vadd.f32 %v148_v21, %v92_v17  ;;  %v681_v23 = vpop.f32.mrb[5].mxu0 }
  0xf7   :  { %v151_v24 = vpop.f32.mrb[6].mxu0 }
  0xf8   :  { %v682_v25 = vpop.f32.mrb[7].mxu0 }
  0xfd   :  { %v208_v28 = vpop.f32.mrb[8].mxu0 }
  0xfe   :  { %v214_v30 = vadd.f32 %v208_v28, %v149_v22  ;;  %v689_v31 = vpop.f32.mrb[9].mxu0 }
  0xff   :  { %v211_v33 = vpop.f32.mrb[10].mxu0 }
 0x100   :  { %v216_v35 = vadd.f32 %v215_v29, %v214_v30  ;;  %v690_v36 = vpop.f32.mrb[11].mxu0 }
 0x102   :  { %v218_v37 = vmul.f32 %v217_v34, %v216_v35 }
 0x104   :  { %v219_v39 = vmax.f32 %v216_v35, %v218_v37 }
 0x106   :  { %558 = vrot.lane.b32.xlu1 %v219_v39, %s870_s21  ;;  %v220_v40 = vpack.c.bf16 %v219_v39, %v219_v39 }
 0x108   :  { %708 = vmatmul.mubr.bf16.vlgmr.msra.gmra.mrb[0].mxu1 %v220_v40 }
 0x109   :  { %747 = vmatprep.mubr.msk.bf16.mxu1 %vm869_vm0, %v868_v0  ;;  %732 = vmatpush3.bf16.msra.mxu1 %v781_v53 }
 0x10a   :  { %733 = vmatprep.subr.bf16.mxu1 %v868_v0 }
 0x10d   :  { %734 = vmatpush3.bf16.msra.mxu1 %v782_v54 }
 0x10e   :  { %735 = vmatprep.subr.bf16.mxu1 %v868_v0 }
 0x111   :  { %736 = vmatpush3.bf16.msra.mxu1 %v783_v4 }
 0x112   :  { %737 = vmatprep.subr.bf16.mxu1 %v868_v0 }
 0x115   :  { %738 = vmatpush3.bf16.msra.mxu1 %v784_v5 }
 0x116   :  { %739 = vmatprep.subr.bf16.mxu1 %v868_v0 }
 0x119   :  { %740 = vmatpush3.bf16.msra.mxu1 %v785_v6 }
 0x11a   :  { %741 = vmatprep.subr.bf16.mxu1 %v868_v0 }
 0x11d   :  { %742 = vmatpush3.bf16.msra.mxu1 %v786_v7 }
 0x11e   :  { %743 = vmatprep.subr.bf16.mxu1 %v868_v0 }
 0x121   :  { %744 = vmatpush3.bf16.msra.mxu1 %v787_v8 }
 0x122   :  { %745 = vmatprep.subr.bf16.mxu1 %v868_v0 }
 0x125   :  { %746 = vmatpush3.bf16.msra.mxu1 %v788_v9 }
 0x178   :  { %v983_v55 = vpop.permute.xlu1 %558 }
 0x1db   :  { %v320_v46 = vpop.f32.mrb[0].mxu1 }
 0x1dc   :  { %v321_v47 = vadd.f32 %v320_v46, %v237_v45  ;;  %v709_v48 = vpop.f32.mrb[1].mxu1 }
 0x1dd   :  { %v323_v49 = vpop.f32.mrb[2].mxu1 }
 0x1de   :  { %v326_v50 = vmax.f32 %v321_v47, 0.0  ;;  %564 = vrot.lane.b32.xlu1 %v321_v47, %s871_s24  ;;  %v710_v51 = vpop.f32.mrb[3].mxu1 }
 0x1e0   :  { %v327_v52 = vpack.c.bf16 %v326_v50, %v326_v50 }
 0x1e2   :  { %728 = vmatmul.mubr.bf16.vlgmr.msra.gmra.mrb[12].mxu0 %v327_v52 }
 0x250   :  { %v565_v56 = vpop.permute.xlu1 %564 }
 0x251   :  { %567 = vst.msk [vmem:[#allocation6] sm:$0xff] %vm54_vm1, %v565_v56 }
 0x2b5   :  { %v427_v58 = vpop.f32.mrb[12].mxu0 }
 0x2b6   :  { %v428_v60 = vadd.f32 %v427_v58, %v344_v57  ;;  %v729_v61 = vpop.f32.mrb[13].mxu0 }
 0x2b7   :  { %v430_v62 = vpop.f32.mrb[14].mxu0 }
 0x2b8   :  { %v730_v63 = vpop.f32.mrb[15].mxu0  ;;  %v434_v1 = vadd.f32 %v433_v59, %v428_v60  ;;  %v441_v3 = vadd.f32 %v440_v2, %v428_v60 }
 0x2ba   :  { %435 = vmax.xlane.f32.xlu0 %v434_v1 }
 0x2be   :  { %442 = vmax.xlane.f32.xlu0 %v441_v3 }
 0x347   :  { %v436_v10 = vpop.xlane.xlu0 %435 }
 0x348   :  { %v438_v14 = vmul.f32 %v437_v11, %v436_v10 }
 0x34b   :  { %v443_v13 = vpop.xlane.xlu0 %442 }
 0x34c   :  { %v445_v15 = vmul.f32 %v444_v12, %v443_v13 }
 0x34e   :  { %v446_v16 = vadd.f32 %v445_v15, %v438_v14 }
 0x350   :  { %v447_v17 = vsub.f32 %v428_v60, %v446_v16 }
 0x352   :  { %v448_v18 = vmul.f32 1.442695, %v447_v17 }
 0x354   :  { %789 = vpow2.f32 %v448_v18 }
 0x35e   :  { %v790_v19 = vpop.eup %789 }
 0x35f   :  { %v450_v20 = vpack.c.bf16 %v790_v19, %v790_v19 }
 0x361   :  { %748 = vmatmul.mubr.bf16.vlgmr.msra.gmra.mrb[4].mxu1 %v450_v20 }
 0x362   :  { %826 = shalt.err (!%p823_p12)
}
 0x363   :  { %s827_s16 = scalar_lea.hbm %s1042_s6, 128 }
 0x364   :  { %p828_p13 = scmp.ne.s32.totalorder %s1042_s6, %s827_s16  ;;  %p831_p0 = scmp.lt.u32.totalorder %s827_s16, %s1042_s6 }
 0x366   :  { %p833_p1 = pnand %p831_p0, %p828_p13 }
 0x368   :  { %836 = shalt.err (!%p833_p1)
}
 0x369   :  { %588 = dma.vmem_to_hbm [thread:$0]  %s586_s13, 128, %s1042_s6, [#allocation7]  }
 0x36a   :  { %s873_s19 = smov [#allocation5]  }
 0x36b   :  { %s575_s20 = sshll.u32 %s873_s19, 4  ;;  %s576_s20 = int_to_ptr.vmem [resolvable:$true] %s575_s20 }
 0x36c   :  { %s837_s6 = scalar_lea.vmem %s576_s20, 128  ;;  %p842_p3 = scmp.lt.s32.totalorder %s576_s20, %s576_s20 }
 0x36d   :  { %p838_p2 = scmp.ne.s32.totalorder %s576_s20, %s837_s6  ;;  %p843_p4 = scmp.lt.s32.totalorder %s837_s6, %s837_s6 }
 0x36f   :  { %p844_p5 = por %p843_p4, %p842_p3 }
 0x371   :  { %p845_p6 = pnand %p844_p5, %p838_p2 }
 0x434   :  { %v549_v0 = vpop.f32.mrb[4].mxu1 }
 0x435   :  { %791 = vrcp.f32 %v549_v0  ;;  %v749_v21 = vpop.f32.mrb[5].mxu1 }
 0x436   :  { %v552_v22 = vpop.f32.mrb[6].mxu1 }
 0x437   :  { %v750_v23 = vpop.f32.mrb[7].mxu1 }
 0x43f   :  { %v792_v24 = vpop.eup %791 }
 0x440   :  { %v556_v25 = vmul.f32 %v792_v24, %v790_v19 }
 0x442   :  { %v561_v26 = vmul.f32 %v983_v55, %v556_v25  ;;  %568 = vst.msk [vmem:[%s1043_s7] sm:$0xff] %vm110_vm2, %v556_v25 }
 0x444   :  { %562 = vst.msk [vmem:[#allocation5] sm:$0xff] %vm110_vm2, %v561_v26 }
 0x445   :  { %848 = shalt.err (!%p845_p6)
}
 0x446   :  { %s849_s25 = scalar_lea.hbm %s1041_s5, 128 }
 0x447   :  { %p850_p7 = scmp.ne.s32.totalorder %s1041_s5, %s849_s25  ;;  %p853_p8 = scmp.lt.u32.totalorder %s849_s25, %s1041_s5 }
 0x449   :  { %p855_p9 = pnand %p853_p8, %p850_p7 }
 0x44b   :  { %858 = shalt.err (!%p855_p9)
}
 0x44c   :  { %578 = dma.vmem_to_hbm [thread:$0]  %s576_s20, 128, %s1041_s5, [#allocation4]  }
 0x44d   :  { %861 = dma.done.wait [#allocation4], 128  }
 0x44e   :  { %862 = vsyncadd [#allocation4], 4294967168 }
 0x44f   :  { %863 = dma.done.wait [#allocation7], 128  }
 0x450   :  { %864 = vsyncadd [#allocation7], 4294967168 }
 0x451   :  { %599 = vsyncpa [#allocation3], 1 }
 0x452   :  { %600 = vsyncpa [#allocation4], 1 }
 0x453   :  { %601 = vsyncpa [#allocation7], 1 }

</bundles_post_ra>
